<compile_context>
chip_gen: v7x
topology: tpu7x:2x2x1
jax: 0.10.0
libtpu: 0.0.40
codegen_flags: <defaults>
</compile_context>

<pallas_src>
import functools

import jax
import jax.numpy as jnp
import numpy as np
from jax import lax
from jax.experimental import pallas as pl
from jax.experimental.pallas import tpu as pltpu


def _apply_final_act(x, name):
    if name is None:
        return x
    if name == "sigmoid":
        return jax.nn.sigmoid(x)
    if name == "relu":
        return jnp.maximum(x, 0.0)
    if name == "softplus":
        return jax.nn.softplus(x)
    if name == "tanh":
        return jnp.tanh(x)
    raise ValueError(f"unsupported final activation: {name}")


def _decoder_kernel(*refs, n_blocks, n_output, eps, final_activations):
    it = iter(refs)
    x_ref = next(it)                                             # (B, n_latent)
    blocks = [tuple(next(it) for _ in range(4)) for _ in range(n_blocks)]
    a_ref = next(it)                                             # (1, n_blocks) SMEM
    wh_ref = next(it)                                            # (3*n_output, n_inter)
    bh_ref = next(it)                                            # (1, 3*n_output)
    out_ref = next(it)                                           # (B, 3*n_output)

    h = x_ref[...].astype(jnp.float32)
    for i, (w_ref, b_ref, g_ref, beta_ref) in enumerate(blocks):
        # Linear: x @ W^T + b  (PyTorch weight layout (out, in)), MXU matmul.
        h = lax.dot_general(h, w_ref[...], (((1,), (1,)), ((), ())),
                            preferred_element_type=jnp.float32)
        h = h + b_ref[...]
        # BatchNorm1d, training-mode batch stats (biased variance), eps=1e-5.
        mean = jnp.mean(h, axis=0, keepdims=True)
        var = jnp.mean((h - mean) ** 2, axis=0, keepdims=True)
        h = (h - mean) * lax.rsqrt(var + eps)
        h = h * g_ref[...] + beta_ref[...]
        # PReLU (single learnable slope per block, PyTorch default).
        a = a_ref[0, i]
        h = jnp.where(h >= 0.0, h, a * h)

    # Three heads fused into one MXU matmul -> lane-dense (B, 3*n_output).
    out = lax.dot_general(h, wh_ref[...], (((1,), (1,)), ((), ())),
                          preferred_element_type=jnp.float32)
    out = out + bh_ref[...]

    if any(act is not None for act in final_activations):
        pieces = []
        for j, act in enumerate(final_activations):
            seg = out[:, j * n_output:(j + 1) * n_output]
            pieces.append(_apply_final_act(seg, act))
        out = jnp.concatenate(pieces, axis=1)

    out_ref[...] = out.astype(out_ref.dtype)


def decoder_forward(x, block_params, prelu_a, head_weights, head_biases,
                    final_activations=(None, None, None), eps=1e-5):
    """Fused Decoder forward.

    x             : (batch, n_latent)
    block_params  : list of (W, b, gamma, beta); W is (out, in), rest (out,)
    prelu_a       : (n_blocks,) PReLU slopes (PyTorch default: 0.25)
    head_weights  : list of 3 arrays, each (n_output, n_inter)
    head_biases   : list of 3 arrays, each (n_output,)
    Returns (retval1, retval2, retval3), each (batch, n_output).
    """
    batch = x.shape[0]
    n_blocks = len(block_params)
    n_output = head_weights[0].shape[0]
    n_inter = head_weights[0].shape[1]

    # Stack the three heads into one weight/bias -> one MXU matmul in-kernel.
    wh = jnp.concatenate([w.astype(jnp.float32) for w in head_weights], axis=0)
    bh = jnp.concatenate(
        [b.astype(jnp.float32) for b in head_biases]).reshape(1, 3 * n_output)
    a = jnp.asarray(prelu_a, jnp.float32).reshape(1, n_blocks)

    inputs = [x.astype(jnp.float32)]
    in_specs = [pl.BlockSpec(memory_space=pltpu.MemorySpace.VMEM)]
    for (w, b, g, beta) in block_params:
        o = w.shape[0]
        inputs += [w.astype(jnp.float32),
                   jnp.asarray(b, jnp.float32).reshape(1, o),
                   jnp.asarray(g, jnp.float32).reshape(1, o),
                   jnp.asarray(beta, jnp.float32).reshape(1, o)]
        in_specs += [pl.BlockSpec(memory_space=pltpu.MemorySpace.VMEM)] * 4
    inputs += [a, wh, bh]
    in_specs += [pl.BlockSpec(memory_space=pltpu.MemorySpace.SMEM),
                 pl.BlockSpec(memory_space=pltpu.MemorySpace.VMEM),
                 pl.BlockSpec(memory_space=pltpu.MemorySpace.VMEM)]

    # Advisory cost estimate for XLA's scheduler.
    flops = 0
    prev = x.shape[1]
    for (w, _, _, _) in block_params:
        flops += 2 * batch * prev * w.shape[0]
        prev = w.shape[0]
    flops += 2 * batch * n_inter * 3 * n_output
    bytes_accessed = (sum(int(np.prod(v.shape)) * 4 for v in inputs)
                      + batch * 3 * n_output * 4)
    cost = pl.CostEstimate(flops=flops,
                           transcendentals=n_blocks * n_inter,
                           bytes_accessed=bytes_accessed)

    kernel = functools.partial(
        _decoder_kernel, n_blocks=n_blocks, n_output=n_output,
        eps=float(eps), final_activations=tuple(final_activations))

    out = pl.pallas_call(
        kernel,
        out_shape=jax.ShapeDtypeStruct((batch, 3 * n_output), jnp.float32),
        in_specs=in_specs,
        out_specs=pl.BlockSpec(memory_space=pltpu.MemorySpace.VMEM),
        cost_estimate=cost,
    )(*inputs)

    return (out[:, :n_output],
            out[:, n_output:2 * n_output],
            out[:, 2 * n_output:])


def _reference(x, block_params, prelu_a, head_weights, head_biases, eps=1e-5):
    """NumPy (float64) reference reproducing the PyTorch forward in train mode."""
    h = np.asarray(x, np.float64)
    for (w, b, g, beta), a in zip(block_params, prelu_a):
        w = np.asarray(w, np.float64)
        h = h @ w.T + np.asarray(b, np.float64)
        mean = h.mean(axis=0)
        var = ((h - mean) ** 2).mean(axis=0)           # biased, as in BN forward
        h = (h - mean) / np.sqrt(var + eps)
        h = h * np.asarray(g, np.float64) + np.asarray(beta, np.float64)
        h = np.where(h >= 0, h, float(a) * h)
    outs = []
    for w, b in zip(head_weights, head_biases):
        outs.append(h @ np.asarray(w, np.float64).T + np.asarray(b, np.float64))
    return outs


if __name__ == "__main__":
    # Decoder(n_output=16, n_latent=8, layer_sizes=[32, 32]) =>
    #   self.layer_sizes = [16, 32, 32, 8]
    #   decoder1 = [Linear(8->32), BN(32), PReLU, Linear(32->32), BN(32), PReLU]
    #   n_inter  = 32 ; decoder21/22/23 = Linear(32->16)
    batch, n_latent, n_output = 8, 8, 16
    hidden = [32, 32]

    key = jax.random.PRNGKey(0)
    keys = jax.random.split(key, 16)

    def xavier(k, shape):
        fan_out, fan_in = shape
        bound = float(np.sqrt(6.0 / (fan_in + fan_out)))
        return jax.random.uniform(k, shape, jnp.float32, -bound, bound)

    x = jax.random.normal(keys[0], (batch, n_latent), jnp.float32)

    dims = [n_latent] + hidden
    block_params = []
    ki = 1
    for i in range(len(hidden)):
        w = xavier(keys[ki], (dims[i + 1], dims[i])); ki += 1
        b = 0.1 * jax.random.normal(keys[ki], (dims[i + 1],), jnp.float32); ki += 1
        g = 1.0 + 0.1 * jax.random.normal(keys[ki], (dims[i + 1],), jnp.float32); ki += 1
        beta = 0.1 * jax.random.normal(keys[ki], (dims[i + 1],), jnp.float32); ki += 1
        block_params.append((w, b, g, beta))
    prelu_a = jnp.full((len(hidden),), 0.25, jnp.float32)   # PyTorch PReLU default

    n_inter = hidden[-1]
    head_weights, head_biases = [], []
    for _ in range(3):
        head_weights.append(xavier(keys[ki], (n_output, n_inter))); ki += 1
        head_biases.append(0.1 * jax.random.normal(keys[ki], (n_output,), jnp.float32)); ki += 1

    outs = decoder_forward(x, block_params, prelu_a, head_weights, head_biases)
    outs = jax.block_until_ready(outs)

    refs = _reference(
        np.asarray(x),
        [(np.asarray(w), np.asarray(b), np.asarray(g), np.asarray(be))
         for (w, b, g, be) in block_params],
        np.asarray(prelu_a),
        [np.asarray(w) for w in head_weights],
        [np.asarray(b) for b in head_biases])

    for o, r in zip(outs, refs):
        err = np.max(np.abs(np.asarray(o, np.float64) - r))
        assert np.allclose(np.asarray(o), r, rtol=1e-4, atol=1e-4), err

    print("KERNEL_OK")
</pallas_src>

<mosaic_0001>
module attributes {stable_mosaic.version = 11 : i64} {
  func.func @_decoder_kernel(%arg0: memref<8x8xf32, #tpu.memory_space<vmem>>, %arg1: memref<32x8xf32, #tpu.memory_space<vmem>>, %arg2: memref<1x32xf32, #tpu.memory_space<vmem>>, %arg3: memref<1x32xf32, #tpu.memory_space<vmem>>, %arg4: memref<1x32xf32, #tpu.memory_space<vmem>>, %arg5: memref<32x32xf32, #tpu.memory_space<vmem>>, %arg6: memref<1x32xf32, #tpu.memory_space<vmem>>, %arg7: memref<1x32xf32, #tpu.memory_space<vmem>>, %arg8: memref<1x32xf32, #tpu.memory_space<vmem>>, %arg9: memref<1x2xf32, #tpu.memory_space<smem>>, %arg10: memref<48x32xf32, #tpu.memory_space<vmem>>, %arg11: memref<1x48xf32, #tpu.memory_space<vmem>>, %arg12: memref<8x48xf32, #tpu.memory_space<vmem>>) attributes {dimension_semantics = [], scalar_prefetch = 0 : i64, scratch_operands = 0 : i64, tpu.core_type = #tpu.core_type<tc>} {
    %c0 = arith.constant 0 : index
    %c0_0 = arith.constant 0 : index
    %0 = vector.load %arg0[%c0, %c0_0] : memref<8x8xf32, #tpu.memory_space<vmem>>, vector<8x8xf32>
    %c0_1 = arith.constant 0 : index
    %c0_2 = arith.constant 0 : index
    %1 = vector.load %arg1[%c0_1, %c0_2] : memref<32x8xf32, #tpu.memory_space<vmem>>, vector<32x8xf32>
    %cst = arith.constant dense<0.000000e+00> : vector<8x32xf32>
    %2 = tpu.matmul %0, %1, %cst {dimension_numbers = #tpu.dot_dimension_numbers<[1], [1], [0], [0], [0, 0, 1, 0], [], []>} : vector<8x8xf32>, vector<32x8xf32>, vector<8x32xf32> -> vector<8x32xf32>
    %c0_3 = arith.constant 0 : index
    %c0_4 = arith.constant 0 : index
    %3 = vector.load %arg2[%c0_3, %c0_4] : memref<1x32xf32, #tpu.memory_space<vmem>>, vector<1x32xf32>
    %4 = vector.broadcast %3 : vector<1x32xf32> to vector<8x32xf32>
    %5 = arith.addf %2, %4 : vector<8x32xf32>
    %cst_5 = arith.constant dense<0.000000e+00> : vector<32xf32>
    %6 = vector.multi_reduction <add>, %5, %cst_5 [0] : vector<8x32xf32> to vector<32xf32>
    %7 = vector.shape_cast %6 : vector<32xf32> to vector<1x32xf32>
    %cst_6 = arith.constant 8.000000e+00 : f32
    %8 = vector.broadcast %cst_6 : f32 to vector<1x32xf32>
    %9 = arith.divf %7, %8 : vector<1x32xf32>
    %10 = vector.broadcast %9 : vector<1x32xf32> to vector<8x32xf32>
    %11 = arith.subf %5, %10 : vector<8x32xf32>
    %12 = arith.mulf %11, %11 : vector<8x32xf32>
    %cst_7 = arith.constant dense<0.000000e+00> : vector<32xf32>
    %13 = vector.multi_reduction <add>, %12, %cst_7 [0] : vector<8x32xf32> to vector<32xf32>
    %14 = vector.shape_cast %13 : vector<32xf32> to vector<1x32xf32>
    %cst_8 = arith.constant 8.000000e+00 : f32
    %15 = vector.broadcast %cst_8 : f32 to vector<1x32xf32>
    %16 = arith.divf %14, %15 : vector<1x32xf32>
    %17 = vector.broadcast %9 : vector<1x32xf32> to vector<8x32xf32>
    %18 = arith.subf %5, %17 : vector<8x32xf32>
    %cst_9 = arith.constant 9.99999974E-6 : f32
    %19 = vector.broadcast %cst_9 : f32 to vector<1x32xf32>
    %20 = arith.addf %16, %19 : vector<1x32xf32>
    %21 = math.rsqrt %20 : vector<1x32xf32>
    %22 = vector.broadcast %21 : vector<1x32xf32> to vector<8x32xf32>
    %23 = arith.mulf %18, %22 : vector<8x32xf32>
    %c0_10 = arith.constant 0 : index
    %c0_11 = arith.constant 0 : index
    %24 = vector.load %arg3[%c0_10, %c0_11] : memref<1x32xf32, #tpu.memory_space<vmem>>, vector<1x32xf32>
    %25 = vector.broadcast %24 : vector<1x32xf32> to vector<8x32xf32>
    %26 = arith.mulf %23, %25 : vector<8x32xf32>
    %c0_12 = arith.constant 0 : index
    %c0_13 = arith.constant 0 : index
    %27 = vector.load %arg4[%c0_12, %c0_13] : memref<1x32xf32, #tpu.memory_space<vmem>>, vector<1x32xf32>
    %28 = vector.broadcast %27 : vector<1x32xf32> to vector<8x32xf32>
    %29 = arith.addf %26, %28 : vector<8x32xf32>
    %c0_14 = arith.constant 0 : index
    %c0_15 = arith.constant 0 : index
    %30 = memref.load %arg9[%c0_14, %c0_15] : memref<1x2xf32, #tpu.memory_space<smem>>
    %cst_16 = arith.constant 0.000000e+00 : f32
    %31 = vector.broadcast %cst_16 : f32 to vector<8x32xf32>
    %32 = arith.cmpf oge, %29, %31 : vector<8x32xf32>
    %33 = vector.broadcast %30 : f32 to vector<8x32xf32>
    %34 = arith.mulf %33, %29 : vector<8x32xf32>
    %35 = arith.select %32, %29, %34 : vector<8x32xi1>, vector<8x32xf32>
    %c0_17 = arith.constant 0 : index
    %c0_18 = arith.constant 0 : index
    %36 = vector.load %arg5[%c0_17, %c0_18] : memref<32x32xf32, #tpu.memory_space<vmem>>, vector<32x32xf32>
    %cst_19 = arith.constant dense<0.000000e+00> : vector<8x32xf32>
    %37 = tpu.matmul %35, %36, %cst_19 {dimension_numbers = #tpu.dot_dimension_numbers<[1], [1], [0], [0], [0, 0, 1, 0], [], []>} : vector<8x32xf32>, vector<32x32xf32>, vector<8x32xf32> -> vector<8x32xf32>
    %c0_20 = arith.constant 0 : index
    %c0_21 = arith.constant 0 : index
    %38 = vector.load %arg6[%c0_20, %c0_21] : memref<1x32xf32, #tpu.memory_space<vmem>>, vector<1x32xf32>
    %39 = vector.broadcast %38 : vector<1x32xf32> to vector<8x32xf32>
    %40 = arith.addf %37, %39 : vector<8x32xf32>
    %cst_22 = arith.constant dense<0.000000e+00> : vector<32xf32>
    %41 = vector.multi_reduction <add>, %40, %cst_22 [0] : vector<8x32xf32> to vector<32xf32>
    %42 = vector.shape_cast %41 : vector<32xf32> to vector<1x32xf32>
    %cst_23 = arith.constant 8.000000e+00 : f32
    %43 = vector.broadcast %cst_23 : f32 to vector<1x32xf32>
    %44 = arith.divf %42, %43 : vector<1x32xf32>
    %45 = vector.broadcast %44 : vector<1x32xf32> to vector<8x32xf32>
    %46 = arith.subf %40, %45 : vector<8x32xf32>
    %47 = arith.mulf %46, %46 : vector<8x32xf32>
    %cst_24 = arith.constant dense<0.000000e+00> : vector<32xf32>
    %48 = vector.multi_reduction <add>, %47, %cst_24 [0] : vector<8x32xf32> to vector<32xf32>
    %49 = vector.shape_cast %48 : vector<32xf32> to vector<1x32xf32>
    %cst_25 = arith.constant 8.000000e+00 : f32
    %50 = vector.broadcast %cst_25 : f32 to vector<1x32xf32>
    %51 = arith.divf %49, %50 : vector<1x32xf32>
    %52 = vector.broadcast %44 : vector<1x32xf32> to vector<8x32xf32>
    %53 = arith.subf %40, %52 : vector<8x32xf32>
    %cst_26 = arith.constant 9.99999974E-6 : f32
    %54 = vector.broadcast %cst_26 : f32 to vector<1x32xf32>
    %55 = arith.addf %51, %54 : vector<1x32xf32>
    %56 = math.rsqrt %55 : vector<1x32xf32>
    %57 = vector.broadcast %56 : vector<1x32xf32> to vector<8x32xf32>
    %58 = arith.mulf %53, %57 : vector<8x32xf32>
    %c0_27 = arith.constant 0 : index
    %c0_28 = arith.constant 0 : index
    %59 = vector.load %arg7[%c0_27, %c0_28] : memref<1x32xf32, #tpu.memory_space<vmem>>, vector<1x32xf32>
    %60 = vector.broadcast %59 : vector<1x32xf32> to vector<8x32xf32>
    %61 = arith.mulf %58, %60 : vector<8x32xf32>
    %c0_29 = arith.constant 0 : index
    %c0_30 = arith.constant 0 : index
    %62 = vector.load %arg8[%c0_29, %c0_30] : memref<1x32xf32, #tpu.memory_space<vmem>>, vector<1x32xf32>
    %63 = vector.broadcast %62 : vector<1x32xf32> to vector<8x32xf32>
    %64 = arith.addf %61, %63 : vector<8x32xf32>
    %c0_31 = arith.constant 0 : index
    %c1 = arith.constant 1 : index
    %65 = memref.load %arg9[%c0_31, %c1] : memref<1x2xf32, #tpu.memory_space<smem>>
    %cst_32 = arith.constant 0.000000e+00 : f32
    %66 = vector.broadcast %cst_32 : f32 to vector<8x32xf32>
    %67 = arith.cmpf oge, %64, %66 : vector<8x32xf32>
    %68 = vector.broadcast %65 : f32 to vector<8x32xf32>
    %69 = arith.mulf %68, %64 : vector<8x32xf32>
    %70 = arith.select %67, %64, %69 : vector<8x32xi1>, vector<8x32xf32>
    %c0_33 = arith.constant 0 : index
    %c0_34 = arith.constant 0 : index
    %71 = vector.load %arg10[%c0_33, %c0_34] : memref<48x32xf32, #tpu.memory_space<vmem>>, vector<48x32xf32>
    %cst_35 = arith.constant dense<0.000000e+00> : vector<8x48xf32>
    %72 = tpu.matmul %70, %71, %cst_35 {dimension_numbers = #tpu.dot_dimension_numbers<[1], [1], [0], [0], [0, 0, 1, 0], [], []>} : vector<8x32xf32>, vector<48x32xf32>, vector<8x48xf32> -> vector<8x48xf32>
    %c0_36 = arith.constant 0 : index
    %c0_37 = arith.constant 0 : index
    %73 = vector.load %arg11[%c0_36, %c0_37] : memref<1x48xf32, #tpu.memory_space<vmem>>, vector<1x48xf32>
    %74 = vector.broadcast %73 : vector<1x48xf32> to vector<8x48xf32>
    %75 = arith.addf %72, %74 : vector<8x48xf32>
    %c0_38 = arith.constant 0 : index
    %c0_39 = arith.constant 0 : index
    %76 = vector.load %arg12[%c0_38, %c0_39] : memref<8x48xf32, #tpu.memory_space<vmem>>, vector<8x48xf32>
    tpu.vector_store %arg12[%c0_38, %c0_39], %75 {strides = array<i32>} : memref<8x48xf32, #tpu.memory_space<vmem>>, vector<8x48xf32>,
    return
  }
}

</mosaic_0001>

<bundles_post_ra>
// kernel: tpu_custom_call.1
= control target key start
LH: loop header
LB: loop body
LE: loop exit
PB: predicated region body
PF: predicated region fallthrough
CT: control target
= control target key end

     0   :  { %17 = vsyncpa [#allocation4], 0  ;;  %s793_s0 = inlined_call_operand.vmem [shape: f32[8,8], index: 0, kind: input, shape index: {}]   ;;  %s794_s1 = inlined_call_operand.vmem [shape: f32[32,8], index: 1, kind: input, shape index: {}]   ;;  %s795_s2 = inlined_call_operand.vmem [shape: f32[1,32], index: 2, kind: input, shape index: {}]   ;;  %s796_s3 = inlined_call_operand.vmem [shape: f32[1,32], index: 3, kind: input, shape index: {}]   ;;  %s797_s4 = inlined_call_operand.vmem [shape: f32[1,32], index: 4, kind: input, shape index: {}]   ;;  %s798_s5 = inlined_call_operand.vmem [shape: f32[32,32], index: 5, kind: input, shape index: {}]   ;;  %s799_s6 = inlined_call_operand.vmem [shape: f32[1,32], index: 6, kind: input, shape index: {}]   ;;  %s800_s7 = inlined_call_operand.vmem [shape: f32[1,32], index: 7, kind: input, shape index: {}]   ;;  %s801_s8 = inlined_call_operand.vmem [shape: f32[1,32], index: 8, kind: input, shape index: {}]   ;;  %s802_s9 = inlined_call_operand.vmem [shape: f32[1,2], index: 9, kind: input, shape index: {}]   ;;  %s803_s10 = inlined_call_operand.vmem [shape: f32[48,32], index: 10, kind: input, shape index: {}]   ;;  %s804_s11 = inlined_call_operand.vmem [shape: f32[1,48], index: 11, kind: input, shape index: {}]   ;;  %s805_s12 = inlined_call_operand.hbm [shape: f32[8,48], index: 12, kind: output, shape index: {}]  }
   0x1   :  { %18 = vsyncpa [#allocation3], 0  ;;  %s43_s23 = sshll.u32 %s802_s9, 4  ;;  %s44_s23 = int_to_ptr.vmem [resolvable:$true] %s43_s23 }
   0x2   :  { %s572_s24 = scalar_lea.vmem %s44_s23, 16  ;;  %p577_p1 = scmp.lt.s32.totalorder %s44_s23, %s44_s23 }
   0x3   :  { %p573_p0 = scmp.ne.s32.totalorder %s44_s23, %s572_s24  ;;  %p578_p2 = scmp.lt.s32.totalorder %s572_s24, %s572_s24 }
   0x5   :  { %p579_p3 = por %p578_p2, %p577_p1 }
   0x7   :  { %p580_p4 = pnand %p579_p3, %p573_p0 }
   0x9   :  { %583 = shalt.err (!%p580_p4)
}
   0xa   :  { %s610_s25 = smov [#allocation2]  }
   0xb   :  { %46 = dma.vmem_to_smem %s44_s23, 16, %s610_s25, [#allocation4]  }
   0xc   :  { %606 = dma.done.wait [#allocation4], 16  }
   0xd   :  { %607 = vsyncadd [#allocation4], 4294967280 }
   0xe   :  { %54 = sfence }
   0xf   :  { %v56_v0 = vld [vmem:[%s794_s1] sm:$0xff]  ;;  %v57_v1 = vld [vmem:[%s794_s1 + $0x8] sm:$0xff]  ;;  %vm67_vm0 = vcmask 64512   ;;  %v611_v2 = vmov 0.0|0.0   ;;  %vm612_vm2 = vmmov 0   ;;  %v613_v4 = vmov 0.0  }
  0x10   :  { %535 = vmatprep.subr.bf16.mxu1 %v611_v2  ;;  %v536_v3 = vpack.c.bf16 %v57_v1, %v56_v0  ;;  %vm537_vm1 = vmpackc.low %vm67_vm0, %vm67_vm0  ;;  %551 = vmatprep.subr.bf16.mxu0 %v611_v2  ;;  %v58_v5 = vld [vmem:[%s794_s1 + $0x10] sm:$0xff]  ;;  %v59_v6 = vld [vmem:[%s794_s1 + $0x18] sm:$0xff]  ;;  %vm153_vm3 = vcmask 261120   ;;  %s614_s24 = smov [#allocation5]   ;;  %vm439_vm7 = vcmask 392192  }
  0x11   :  { %506 = vmatprep.mubr.msk.f32.mxu1 %vm612_vm2, %v613_v4  ;;  %532 = vmatprep.mubr.msk.f32.mxu0 %vm612_vm2, %v613_v4  ;;  %v540_v7 = vpack.c.bf16 %v59_v6, %v58_v5  ;;  %v55_v8 = vld [vmem:[%s793_s0] sm:$0xff]  ;;  %v198_v10 = vld [vmem:[%s798_s5 + $0x8] sm:$0xff]  ;;  %vm713_vm4 = vmpackc.low %vm153_vm3, %vm153_vm3 }
  0x12   :  { %538 = vmatpush3.bf16.xpose.msk.msra.mxu1 %vm537_vm1, %v536_v3  ;;  %v197_v9 = vld [vmem:[%s798_s5] sm:$0xff]  ;;  %v199_v13 = vld [vmem:[%s798_s5 + $0x10] sm:$0xff]  ;;  %v200_v14 = vld [vmem:[%s798_s5 + $0x18] sm:$0xff] }
  0x13   :  { %539 = vmatprep.subr.bf16.mxu1 %v611_v2  ;;  %v544_v11 = vpack.c.bf16 %v198_v10, %v197_v9  ;;  %v548_v15 = vpack.c.bf16 %v200_v14, %v199_v13  ;;  %v456_v16 = vld [vmem:[%s795_s2] ss:$0 sm:$0xff]  ;;  %s192_s2 = sld [smem:[#allocation2]]  ;;  %v336_v49 = vld [vmem:[%s803_s10 + $0x8] sm:$0xff]  ;;  %v337_v51 = vld [vmem:[%s803_s10 + $0x10] sm:$0xff] }
  0x14   :  { %v462_v40 = vld [vmem:[%s796_s3] ss:$0 sm:$0xff]  ;;  %v338_v52 = vld [vmem:[%s803_s10 + $0x18] sm:$0xff]  ;;  %v340_v55 = vld [vmem:[%s803_s10 + $0x28] sm:$0xff] }
  0x15   :  { %v463_v42 = vld [vmem:[%s797_s4] ss:$0 sm:$0xff]  ;;  %v556_v53 = vpack.c.bf16 %v338_v52, %v337_v51 }
  0x16   :  { %v335_v48 = vld [vmem:[%s803_s10] sm:$0xff] }
  0x17   :  { %v552_v50 = vpack.c.bf16 %v336_v49, %v335_v48  ;;  %v339_v54 = vld [vmem:[%s803_s10 + $0x20] sm:$0xff] }
  0x18   :  { %v560_v56 = vpack.c.bf16 %v340_v55, %v339_v54  ;;  %v464_v57 = vld [vmem:[%s799_s6] ss:$0 sm:$0xff]  ;;  %s472_s6 = sld [smem:[#allocation2 + $0x1]] }
  0x19   :  { %v194_v44 = vstv %s192_s2  ;;  %554 = vmatpush3.bf16.xpose.msk.msra.mxu0 %vm713_vm4, %v552_v50  ;;  %s447_s2 = sshll.u32 %s614_s24, 4  ;;  %s448_s2 = int_to_ptr.vmem [resolvable:$true] %s447_s2 }
  0x1a   :  { %542 = vmatpush3.bf16.xpose.msk.msra.mxu1 %vm537_vm1, %v540_v7  ;;  %555 = vmatprep.subr.bf16.mxu0 %v611_v2  ;;  %p589_p6 = scmp.lt.s32.totalorder %s448_s2, %s448_s2 }
  0x1b   :  { %543 = vmatprep.subr.bf16.mxu1 %v611_v2 }
  0x21   :  { %507 = vmatmul.mubr.msk.f32.vlgmr.msra.gmra.mrb[0].mxu1 %vm67_vm0, %v55_v8  ;;  %558 = vmatpush3.bf16.xpose.msk.msra.mxu0 %vm713_vm4, %v556_v53 }
  0x22   :  { %517 = vmatprep.mubr.msk.f32.mxu1 %vm612_vm2, %v613_v4  ;;  %546 = vmatpush3.bf16.xpose.msk.msra.mxu1 %vm713_vm4, %v544_v11 }
  0x23   :  { %547 = vmatprep.subr.bf16.mxu1 %v611_v2  ;;  %559 = vmatprep.subr.bf16.mxu0 %v611_v2 }
  0x29   :  { %562 = vmatpush3.bf16.xpose.msk.msra.mxu0 %vm713_vm4, %v560_v56 }
  0x2a   :  { %550 = vmatpush3.bf16.xpose.msk.msra.mxu1 %vm713_vm4, %v548_v15 }
  0xf4   :  { %v149_v17 = vpop.f32.mrb[0].mxu1 }
  0xf5   :  { %v150_v18 = vadd.f32 %v456_v16, %v149_v17  ;;  %v508_v19 = vpop.f32.mrb[1].mxu1  ;;  %v470_v17 = vld [vmem:[%s800_s7] ss:$0 sm:$0xff]  ;;  %s584_s7 = scalar_lea.vmem %s448_s2, 128 }
  0xf6   :  { %v471_v19 = vld [vmem:[%s801_s8] ss:$0 sm:$0xff]  ;;  %p585_p5 = scmp.ne.s32.totalorder %s448_s2, %s584_s7  ;;  %p590_p7 = scmp.lt.s32.totalorder %s584_s7, %s584_s7 }
  0xf7   :  { %v154_v20 = vsel %vm153_vm3, %v150_v18, 0.0 }
  0xf8   :  { %v155_v21 = vrot.slane %v154_v20, 4  ;;  %p591_p8 = por %p590_p7, %p589_p6 }
  0xfa   :  { %v156_v22 = vadd.f32 %v155_v21, %v154_v20  ;;  %v332_v21 = vstv %s472_s6  ;;  %p592_p9 = pnand %p591_p8, %p585_p5 }
  0xfc   :  { %v157_v23 = vrot.slane %v156_v22, 2 }
  0xfe   :  { %v158_v24 = vadd.f32 %v157_v23, %v156_v22 }
 0x100   :  { %v159_v25 = vrot.slane %v158_v24, 1 }
 0x102   :  { %v160_v26 = vadd.f32 %v159_v25, %v158_v24  ;;  %v473_v25 = vld [vmem:[%s804_s11] ss:$0 sm:$0xff] }
 0x104   :  { %v162_v27 = vmul.f32 0.125, %v160_v26 }
 0x106   :  { %v163_v28 = vsub.f32 %v150_v18, %v162_v27 }
 0x108   :  { %v164_v29 = vmul.f32 %v163_v28, %v163_v28 }
 0x10a   :  { %v165_v30 = vsel %vm153_vm3, %v164_v29, 0.0 }
 0x10b   :  { %v166_v31 = vrot.slane %v165_v30, 4 }
 0x10d   :  { %v167_v32 = vadd.f32 %v166_v31, %v165_v30 }
 0x10f   :  { %v168_v33 = vrot.slane %v167_v32, 2 }
 0x111   :  { %v169_v34 = vadd.f32 %v168_v33, %v167_v32 }
 0x113   :  { %v170_v35 = vrot.slane %v169_v34, 1 }
 0x115   :  { %v171_v36 = vadd.f32 %v170_v35, %v169_v34 }
 0x117   :  { %v172_v37 = vmul.f32 0.125, %v171_v36 }
 0x119   :  { %v173_v38 = vadd.f32 1e-05, %v172_v37 }
 0x11b   :  { %568 = vrsqrt.f32 %v173_v38 }
 0x125   :  { %v569_v39 = vpop.eup %568 }
 0x126   :  { %v175_v41 = vmul.f32 %v569_v39, %v163_v28 }
 0x128   :  { %v183_v43 = vmul.f32 %v462_v40, %v175_v41 }
 0x12a   :  { %v191_v45 = vadd.f32 %v463_v42, %v183_v43 }
 0x12c   :  { %vm193_vm5 = vcmp.ge.f32.partialorder %v191_v45, 0.0  ;;  %v195_v46 = vmul.f32 %v194_v44, %v191_v45 }
 0x12e   :  { %v196_v47 = vsel %vm193_vm5, %v191_v45, %v195_v46 }
 0x12f   :  { %518 = vmatmul.mubr.msk.f32.vlgmr.msra.gmra.mrb[2].mxu1 %vm153_vm3, %v196_v47 }
 0x202   :  { %v289_v58 = vpop.f32.mrb[2].mxu1 }
 0x203   :  { %v290_v59 = vadd.f32 %v464_v57, %v289_v58  ;;  %v519_v60 = vpop.f32.mrb[3].mxu1 }
 0x205   :  { %v293_v61 = vsel %vm153_vm3, %v290_v59, 0.0 }
 0x206   :  { %v294_v62 = vrot.slane %v293_v61, 4 }
 0x208   :  { %v295_v63 = vadd.f32 %v294_v62, %v293_v61 }
 0x20a   :  { %v296_v0 = vrot.slane %v295_v63, 2 }
 0x20c   :  { %v297_v1 = vadd.f32 %v296_v0, %v295_v63 }
 0x20e   :  { %v298_v2 = vrot.slane %v297_v1, 1 }
 0x210   :  { %v299_v3 = vadd.f32 %v298_v2, %v297_v1 }
 0x212   :  { %v300_v4 = vmul.f32 0.125, %v299_v3 }
 0x214   :  { %v301_v5 = vsub.f32 %v290_v59, %v300_v4 }
 0x216   :  { %v302_v6 = vmul.f32 %v301_v5, %v301_v5 }
 0x218   :  { %v303_v7 = vsel %vm153_vm3, %v302_v6, 0.0 }
 0x219   :  { %v304_v8 = vrot.slane %v303_v7, 4 }
 0x21b   :  { %v305_v9 = vadd.f32 %v304_v8, %v303_v7 }
 0x21d   :  { %v306_v10 = vrot.slane %v305_v9, 2 }
 0x21f   :  { %v307_v11 = vadd.f32 %v306_v10, %v305_v9 }
 0x221   :  { %v308_v12 = vrot.slane %v307_v11, 1 }
 0x223   :  { %v309_v13 = vadd.f32 %v308_v12, %v307_v11 }
 0x225   :  { %v310_v14 = vmul.f32 0.125, %v309_v13 }
 0x227   :  { %v311_v15 = vadd.f32 1e-05, %v310_v14 }
 0x229   :  { %570 = vrsqrt.f32 %v311_v15 }
 0x233   :  { %v571_v16 = vpop.eup %570 }
 0x234   :  { %v313_v18 = vmul.f32 %v571_v16, %v301_v5 }
 0x236   :  { %v321_v20 = vmul.f32 %v470_v17, %v313_v18 }
 0x238   :  { %v329_v22 = vadd.f32 %v471_v19, %v321_v20 }
 0x23a   :  { %vm331_vm6 = vcmp.ge.f32.partialorder %v329_v22, 0.0  ;;  %v333_v23 = vmul.f32 %v332_v21, %v329_v22 }
 0x23c   :  { %v334_v24 = vsel %vm331_vm6, %v329_v22, %v333_v23 }
 0x23d   :  { %533 = vmatmul.mubr.msk.f32.vlgmr.msra.gmra.mrb[0].mxu0 %vm153_vm3, %v334_v24 }
 0x310   :  { %v435_v26 = vpop.f32.mrb[0].mxu0 }
 0x311   :  { %v436_v27 = vadd.f32 %v473_v25, %v435_v26  ;;  %v534_v28 = vpop.f32.mrb[1].mxu0 }
 0x313   :  { %440 = vst.msk [vmem:[#allocation5] sm:$0xff] %vm439_vm7, %v436_v27 }
 0x314   :  { %595 = shalt.err (!%p592_p9)
}
 0x315   :  { %s596_s25 = scalar_lea.hbm %s805_s12, 128 }
 0x316   :  { %p597_p10 = scmp.ne.s32.totalorder %s805_s12, %s596_s25  ;;  %p600_p11 = scmp.lt.u32.totalorder %s596_s25, %s805_s12 }
 0x318   :  { %p602_p12 = pnand %p600_p11, %p597_p10 }
 0x31a   :  { %605 = shalt.err (!%p602_p12)
}
 0x31b   :  { %450 = dma.vmem_to_hbm [thread:$0]  %s448_s2, 128, %s805_s12, [#allocation3]  }
 0x31c   :  { %608 = dma.done.wait [#allocation3], 128  }
 0x31d   :  { %609 = vsyncadd [#allocation3], 4294967168 }
 0x31e   :  { %454 = vsyncpa [#allocation3], 1 }
 0x31f   :  { %455 = vsyncpa [#allocation4], 1 }

</bundles_post_ra>
